<compile_context>
chip_gen: v7x
topology: tpu7x:2x2x1
jax: 0.10.0
libtpu: 0.0.40
codegen_flags: <defaults>
</compile_context>

<pallas_src>
import functools

import numpy as np
import jax
import jax.numpy as jnp
from jax.experimental import pallas as pl
from jax.experimental.pallas import tpu as pltpu


def _round_up(v, m):
    return (v + m - 1) // m * m


def gat_kernel(f_ref, g_ref, adj_ref, h_ref, out_ref, acc_ref, den_ref, *,
               alpha, bf16_matmul):
    """One (src-tile i, dst-tile j) grid step.

    f_ref   : (TM, 1)   f[i] = <h_i, a1>                (f32)
    g_ref   : (1, TN)   g[j] = <h_j, a2>                (f32)
    adj_ref : (TM, TN)  {0,1} adjacency mask            (int8)
    h_ref   : (TN, Cp)  projected dst-node features     (f32, lane-padded)
    out_ref : (TM, Cp)  h_prime row tile                (f32, lane-padded)
    acc_ref : (TM, Cp)  f32 scratch accumulator for  sum_j e[i,j] * h[j]
    den_ref : (TM, 1)   f32 scratch accumulator for  sum_j e[i,j]
    """
    j = pl.program_id(1)

    @pl.when(j == 0)
    def _():
        acc_ref[...] = jnp.zeros_like(acc_ref)
        den_ref[...] = jnp.zeros_like(den_ref)

    # edge score s[i, j] = <cat(h_i, h_j), a> = f[i] + g[j]   (rank-1 outer add, VPU)
    s = f_ref[...] + g_ref[...]                              # (TM, TN)
    s = jnp.where(s > 0.0, s, alpha * s)                     # LeakyReLU
    # Mask BEFORE the exp: non-edges go to -1e30 so exp underflows to exactly 0
    # (avoids the exp-overflow * 0 -> NaN hazard of masking after the exp).
    s = jnp.where(adj_ref[...] != 0, s, -1e30)
    e = jnp.exp(s)                                           # EUP

    den_ref[...] += jnp.sum(e, axis=-1, keepdims=True)       # (TM, 1)
    if bf16_matmul:
        # v6e/v7x: bf16 MXU operands, f32 accumulate (flash-attention style).
        acc_ref[...] += jnp.dot(e.astype(jnp.bfloat16),
                                h_ref[...].astype(jnp.bfloat16),
                                preferred_element_type=jnp.float32)
    else:
        acc_ref[...] += jnp.dot(e, h_ref[...],
                                preferred_element_type=jnp.float32)

    @pl.when(j == pl.num_programs(1) - 1)
    def _():
        # One reciprocal per row tile, then a broadcast multiply.
        # (Clamp guards padded / edge-less rows against 0/0 -> NaN; real rows
        #  always have at least a self-loop so the clamp never triggers.)
        inv = 1.0 / jnp.maximum(den_ref[...], 1e-30)          # (TM, 1)
        out_ref[...] = (acc_ref[...] * inv).astype(out_ref.dtype)


def gat_layer(x, W, a, adj, alpha=0.2, block_m=256, block_n=512,
              bf16_matmul=False):
    """GAT forward.  adj: dense (N, N) {0,1} adjacency (self-loops included)."""
    N, Cin = x.shape
    Cout = W.shape[1]

    # ---------------- plain-JAX preamble (O(N*Cin), XLA handles it) -------------
    # Lane-dense output: pad Cout up to a multiple of 128 (zeros), slice at the end.
    Cp = _round_up(Cout, 128)
    Wp = jnp.pad(W.astype(jnp.float32), ((0, 0), (0, Cp - Cout)))
    h = jnp.dot(x, Wp)                                   # (N, Cp), padded cols are 0
    a1 = a[:, :Cout]                                     # (1, Cout)
    a2 = a[:, Cout:]                                     # (1, Cout)
    f = jnp.dot(x, jnp.dot(W, a1.T))                     # (N, 1)  == <h_i, a1>
    g = jnp.dot(x, jnp.dot(W, a2.T)).T                   # (1, N)  == <h_j, a2>

    # ---------------- tiling: src rows (parallel) x dst cols (reduction) --------
    tm = min(block_m, _round_up(N, 32))    # int8 adj sublane tiling -> multiple of 32
    tn = min(block_n, _round_up(N, 128))   # lane dimension -> multiple of 128
    Nm = _round_up(N, tm)                  # padded src-row count
    Nn = _round_up(N, tn)                  # padded dst-col count

    f_p = jnp.pad(f, ((0, Nm - N), (0, 0)))
    g_p = jnp.pad(g, ((0, 0), (0, Nn - N)))
    h_p = jnp.pad(h, ((0, Nn - N), (0, 0)))
    adj_p = jnp.pad(adj.astype(jnp.int8), ((0, Nm - N), (0, Nn - N)))

    grid = (Nm // tm, Nn // tn)

    cost = pl.CostEstimate(
        flops=2 * Nm * Nn * Cp + 4 * Nm * Nn,
        transcendentals=Nm * Nn,
        bytes_accessed=(Nm * Nn                      # int8 adj (dominant at large N)
                        + (Nm + Nn) * 4              # f, g
                        + (Nm // tm) * Nn * Cp * 4   # streamed h tiles
                        + Nm * Cp * 4),              # output
    )

    out_p = pl.pallas_call(
        functools.partial(gat_kernel, alpha=alpha, bf16_matmul=bf16_matmul),
        out_shape=jax.ShapeDtypeStruct((Nm, Cp), jnp.float32),
        grid_spec=pltpu.PrefetchScalarGridSpec(
            num_scalar_prefetch=0,
            grid=grid,
            in_specs=[
                pl.BlockSpec((tm, 1), lambda i, j: (i, 0)),    # f   (src rows)
                pl.BlockSpec((1, tn), lambda i, j: (0, j)),    # g   (dst cols)
                # TODO(synk): on v7x consider pipeline_mode=pl.Buffered(3) on adj.
                pl.BlockSpec((tm, tn), lambda i, j: (i, j)),   # adj (int8 mask)
                pl.BlockSpec((tn, Cp), lambda i, j: (j, 0)),   # h   (dst rows)
            ],
            out_specs=pl.BlockSpec((tm, Cp), lambda i, j: (i, 0)),
            scratch_shapes=[pltpu.VMEM((tm, Cp), jnp.float32),
                            pltpu.VMEM((tm, 1), jnp.float32)],
        ),
        compiler_params=pltpu.CompilerParams(
            dimension_semantics=("parallel", "arbitrary"),
            vmem_limit_bytes=64 * 1024 * 1024),
        cost_estimate=cost,
    )(f_p, g_p, adj_p, h_p)

    # TODO(synk): edge_weight / output_weight branches of the PyTorch forward and
    # training-mode dropout (p=0.0 default) are not implemented here.
    return out_p[:N, :Cout]


def reference(x, W, a, edge_index, alpha=0.2):
    """Pure-JAX re-implementation of the PyTorch forward (sparse spmm path)."""
    h = x @ W
    N = x.shape[0]
    src, dst = edge_index[0], edge_index[1]
    edge_h = jnp.concatenate([h[src], h[dst]], axis=-1)               # (E, 2*Cout)
    edge_e = jnp.exp(jax.nn.leaky_relu((edge_h * a).sum(-1), alpha))  # (E,)
    e_expsum = jax.ops.segment_sum(edge_e, src, N)[:, None]           # (N, 1)
    h_prime = jax.ops.segment_sum(edge_e[:, None] * h[dst], src, N)   # (N, Cout)
    return h_prime / e_expsum


if __name__ == "__main__":
    N, Cin, Cout = 64, 32, 32
    alpha = 0.2

    key = jax.random.PRNGKey(0)
    kx, kw, ka, ks, kd = jax.random.split(key, 5)

    # Deterministic xavier_uniform_-style init (gain = 1.414), as in reset_parameters().
    bound_w = 1.414 * np.sqrt(6.0 / (Cin + Cout))
    W = jax.random.uniform(kw, (Cin, Cout), jnp.float32, -bound_w, bound_w)
    bound_a = 1.414 * np.sqrt(6.0 / (2 * Cout + 1))
    a = jax.random.uniform(ka, (1, 2 * Cout), jnp.float32, -bound_a, bound_a)

    x = jax.random.normal(kx, (N, Cin), jnp.float32)

    # Random duplicate-free edge list; remove_self_loops then add_self_loops.
    src = np.asarray(jax.random.randint(ks, (256,), 0, N))
    dst = np.asarray(jax.random.randint(kd, (256,), 0, N))
    keep = src != dst                                             # remove_self_loops
    edges = np.unique(np.stack([src[keep], dst[keep]], axis=1), axis=0)
    loops = np.stack([np.arange(N), np.arange(N)], axis=1)        # add_self_loops
    edges = np.concatenate([edges, loops], axis=0).astype(np.int32)
    edge_index = jnp.asarray(edges.T)                             # (2, E)

    # Dense int8 adjacency mask used by the kernel (4x smaller than f32).
    adj_np = np.zeros((N, N), dtype=np.int8)
    adj_np[edges[:, 0], edges[:, 1]] = 1
    adj = jnp.asarray(adj_np)

    out = gat_layer(x, W, a, adj, alpha=alpha)
    out = jax.block_until_ready(out)

    ref = reference(x, W, a, edge_index, alpha=alpha)
    np.testing.assert_allclose(np.asarray(out), np.asarray(ref), rtol=1e-4, atol=1e-4)
    print("KERNEL_OK")
</pallas_src>

<mosaic_0001>
module attributes {stable_mosaic.version = 11 : i64} {
  func.func @gat_kernel(%arg0: i32, %arg1: i32, %arg2: memref<64x1xf32, #tpu.memory_space<vmem>>, %arg3: memref<1x128xf32, #tpu.memory_space<vmem>>, %arg4: memref<64x128xi8, #tpu.memory_space<vmem>>, %arg5: memref<128x128xf32, #tpu.memory_space<vmem>>, %arg6: memref<64x128xf32, #tpu.memory_space<vmem>>, %arg7: memref<64x128xf32, #tpu.memory_space<vmem>>, %arg8: memref<64x1xf32, #tpu.memory_space<vmem>>) attributes {dimension_semantics = [#tpu.dimension_semantics<parallel>, #tpu.dimension_semantics<arbitrary>], iteration_bounds = array<i64: 1, 1>, scalar_prefetch = 0 : i64, scratch_operands = 2 : i64, tpu.core_type = #tpu.core_type<tc>, window_params = [{transform_indices = @transform_0, window_bounds = array<i64: 64, 1>}, {transform_indices = @transform_1, window_bounds = array<i64: 1, 128>}, {transform_indices = @transform_2, window_bounds = array<i64: 64, 128>}, {transform_indices = @transform_3, window_bounds = array<i64: 128, 128>}, {transform_indices = @transform_4, window_bounds = array<i64: 64, 128>}]} {
    %c0_i32 = arith.constant 0 : i32
    %0 = arith.cmpi eq, %arg1, %c0_i32 : i32
    %1 = arith.extui %0 : i1 to i32
    %c0_i32_0 = arith.constant 0 : i32
    %2 = arith.cmpi ne, %1, %c0_i32_0 : i32
    scf.if %2 {
      %cst_22 = arith.constant 0.000000e+00 : f32
      %32 = vector.broadcast %cst_22 : f32 to vector<64x128xf32>
      %c0_23 = arith.constant 0 : index
      %c0_24 = arith.constant 0 : index
      %33 = vector.load %arg7[%c0_23, %c0_24] : memref<64x128xf32, #tpu.memory_space<vmem>>, vector<64x128xf32>
      tpu.vector_store %arg7[%c0_23, %c0_24], %32 {strides = array<i32>} : memref<64x128xf32, #tpu.memory_space<vmem>>, vector<64x128xf32>,
      %cst_25 = arith.constant 0.000000e+00 : f32
      %34 = vector.broadcast %cst_25 : f32 to vector<64x1xf32>
      %c0_26 = arith.constant 0 : index
      %c0_27 = arith.constant 0 : index
      %35 = vector.load %arg8[%c0_26, %c0_27] : memref<64x1xf32, #tpu.memory_space<vmem>>, vector<64x1xf32>
      tpu.vector_store %arg8[%c0_26, %c0_27], %34 {strides = array<i32>} : memref<64x1xf32, #tpu.memory_space<vmem>>, vector<64x1xf32>,
    } else {
    }
    %c0 = arith.constant 0 : index
    %c0_1 = arith.constant 0 : index
    %3 = vector.load %arg2[%c0, %c0_1] : memref<64x1xf32, #tpu.memory_space<vmem>>, vector<64x1xf32>
    %c0_2 = arith.constant 0 : index
    %c0_3 = arith.constant 0 : index
    %4 = vector.load %arg3[%c0_2, %c0_3] : memref<1x128xf32, #tpu.memory_space<vmem>>, vector<1x128xf32>
    %5 = vector.broadcast %3 : vector<64x1xf32> to vector<64x128xf32>
    %6 = vector.broadcast %4 : vector<1x128xf32> to vector<64x128xf32>
    %7 = arith.addf %5, %6 : vector<64x128xf32>
    %cst = arith.constant 0.000000e+00 : f32
    %8 = vector.broadcast %cst : f32 to vector<64x128xf32>
    %9 = arith.cmpf ogt, %7, %8 : vector<64x128xf32>
    %cst_4 = arith.constant 2.000000e-01 : f32
    %10 = vector.broadcast %cst_4 : f32 to vector<64x128xf32>
    %11 = arith.mulf %10, %7 : vector<64x128xf32>
    %12 = arith.select %9, %7, %11 : vector<64x128xi1>, vector<64x128xf32>
    %c0_5 = arith.constant 0 : index
    %c0_6 = arith.constant 0 : index
    %13 = vector.load %arg4[%c0_5, %c0_6] : memref<64x128xi8, #tpu.memory_space<vmem>>, vector<64x128xi8>
    %c0_i8 = arith.constant 0 : i8
    %14 = vector.broadcast %c0_i8 : i8 to vector<64x128xi8>
    %15 = arith.cmpi ne, %13, %14 : vector<64x128xi8>
    %cst_7 = arith.constant -1.000000e+30 : f32
    %16 = vector.broadcast %cst_7 : f32 to vector<64x128xf32>
    %17 = arith.select %15, %12, %16 : vector<64x128xi1>, vector<64x128xf32>
    %18 = math.exp %17 : vector<64x128xf32>
    %c0_8 = arith.constant 0 : index
    %c0_9 = arith.constant 0 : index
    %19 = vector.load %arg8[%c0_8, %c0_9] : memref<64x1xf32, #tpu.memory_space<vmem>>, vector<64x1xf32>
    %cst_10 = arith.constant dense<0.000000e+00> : vector<64xf32>
    %20 = vector.multi_reduction <add>, %18, %cst_10 [1] : vector<64x128xf32> to vector<64xf32>
    %21 = vector.shape_cast %20 : vector<64xf32> to vector<64x1xf32>
    %22 = arith.addf %19, %21 : vector<64x1xf32>
    %c0_11 = arith.constant 0 : index
    %c0_12 = arith.constant 0 : index
    %23 = vector.load %arg8[%c0_11, %c0_12] : memref<64x1xf32, #tpu.memory_space<vmem>>, vector<64x1xf32>
    tpu.vector_store %arg8[%c0_11, %c0_12], %22 {strides = array<i32>} : memref<64x1xf32, #tpu.memory_space<vmem>>, vector<64x1xf32>,
    %c0_13 = arith.constant 0 : index
    %c0_14 = arith.constant 0 : index
    %24 = vector.load %arg7[%c0_13, %c0_14] : memref<64x128xf32, #tpu.memory_space<vmem>>, vector<64x128xf32>
    %c0_15 = arith.constant 0 : index
    %c0_16 = arith.constant 0 : index
    %25 = vector.load %arg5[%c0_15, %c0_16] : memref<128x128xf32, #tpu.memory_space<vmem>>, vector<128x128xf32>
    %cst_17 = arith.constant dense<0.000000e+00> : vector<64x128xf32>
    %26 = tpu.matmul %18, %25, %cst_17 {dimension_numbers = #tpu.dot_dimension_numbers<[1], [0], [0], [1], [0, 0, 1, 1], [], []>} : vector<64x128xf32>, vector<128x128xf32>, vector<64x128xf32> -> vector<64x128xf32>
    %27 = arith.addf %24, %26 : vector<64x128xf32>
    %c0_18 = arith.constant 0 : index
    %c0_19 = arith.constant 0 : index
    %28 = vector.load %arg7[%c0_18, %c0_19] : memref<64x128xf32, #tpu.memory_space<vmem>>, vector<64x128xf32>
    tpu.vector_store %arg7[%c0_18, %c0_19], %27 {strides = array<i32>} : memref<64x128xf32, #tpu.memory_space<vmem>>, vector<64x128xf32>,
    %c0_i32_20 = arith.constant 0 : i32
    %29 = arith.cmpi eq, %arg1, %c0_i32_20 : i32
    %30 = arith.extui %29 : i1 to i32
    %c0_i32_21 = arith.constant 0 : i32
    %31 = arith.cmpi ne, %30, %c0_i32_21 : i32
    scf.if %31 {
      %c0_22 = arith.constant 0 : index
      %c0_23 = arith.constant 0 : index
      %32 = vector.load %arg8[%c0_22, %c0_23] : memref<64x1xf32, #tpu.memory_space<vmem>>, vector<64x1xf32>
      %cst_24 = arith.constant 1.000000e-30 : f32
      %33 = vector.broadcast %cst_24 : f32 to vector<64x1xf32>
      %34 = arith.maximumf %32, %33 : vector<64x1xf32>
      %cst_25 = arith.constant 1.000000e+00 : f32
      %35 = vector.broadcast %cst_25 : f32 to vector<64x1xf32>
      %36 = arith.divf %35, %34 : vector<64x1xf32>
      %c0_26 = arith.constant 0 : index
      %c0_27 = arith.constant 0 : index
      %37 = vector.load %arg7[%c0_26, %c0_27] : memref<64x128xf32, #tpu.memory_space<vmem>>, vector<64x128xf32>
      %38 = vector.broadcast %36 : vector<64x1xf32> to vector<64x128xf32>
      %39 = arith.mulf %37, %38 : vector<64x128xf32>
      %c0_28 = arith.constant 0 : index
      %c0_29 = arith.constant 0 : index
      %40 = vector.load %arg6[%c0_28, %c0_29] : memref<64x128xf32, #tpu.memory_space<vmem>>, vector<64x128xf32>
      tpu.vector_store %arg6[%c0_28, %c0_29], %39 {strides = array<i32>} : memref<64x128xf32, #tpu.memory_space<vmem>>, vector<64x128xf32>,
    } else {
    }
    return
  }
  func.func @transform_0(%arg0: i32, %arg1: i32) -> (i32, i32) {
    %c0_i32 = arith.constant 0 : i32
    %c0_i32_0 = arith.constant 0 : i32
    return %arg0, %c0_i32 : i32, i32
  }
  func.func @transform_1(%arg0: i32, %arg1: i32) -> (i32, i32) {
    %c0_i32 = arith.constant 0 : i32
    %c0_i32_0 = arith.constant 0 : i32
    return %c0_i32, %arg1 : i32, i32
  }
  func.func @transform_2(%arg0: i32, %arg1: i32) -> (i32, i32) {
    %c0_i32 = arith.constant 0 : i32
    return %arg0, %arg1 : i32, i32
  }
  func.func @transform_3(%arg0: i32, %arg1: i32) -> (i32, i32) {
    %c0_i32 = arith.constant 0 : i32
    %c0_i32_0 = arith.constant 0 : i32
    return %arg1, %c0_i32 : i32, i32
  }
  func.func @transform_4(%arg0: i32, %arg1: i32) -> (i32, i32) {
    %c0_i32 = arith.constant 0 : i32
    %c0_i32_0 = arith.constant 0 : i32
    return %arg0, %c0_i32 : i32, i32
  }
}

</mosaic_0001>

<bundles_post_ra>
// kernel: tpu_custom_call.1
= control target key start
LH: loop header
LB: loop body
LE: loop exit
PB: predicated region body
PF: predicated region fallthrough
CT: control target
= control target key end

     0   :  { %9 = vsyncpa [#allocation5], 0  ;;  %s1061_s0 = inlined_call_operand.hbm [shape: f32[64,1], index: 0, kind: input, shape index: {}]   ;;  %s1062_s1 = inlined_call_operand.hbm [shape: f32[1,128], index: 1, kind: input, shape index: {}]   ;;  %s1063_s2 = inlined_call_operand.hbm [shape: s8[64,128], index: 2, kind: input, shape index: {}]   ;;  %s1064_s3 = inlined_call_operand.hbm [shape: f32[128,128], index: 3, kind: input, shape index: {}]   ;;  %s1065_s4 = inlined_call_operand.hbm [shape: f32[64,128], index: 4, kind: output, shape index: {}]  }
   0x1   :  { %10 = vsyncpa [#allocation8], 0 }
   0x2   :  { %11 = vsyncpa [#allocation11], 0 }
   0x3   :  { %12 = vsyncpa [#allocation6], 0  ;;  %s849_s15 = smov [#allocation7]   ;;  %s850_s17 = smov [#allocation4]  }
   0x4   :  { %s31_s16 = sshll.u32 %s849_s15, 4  ;;  %s18_s18 = sshll.u32 %s850_s17, 4  ;;  %s32_s16 = int_to_ptr.vmem [resolvable:$true] %s31_s16  ;;  %s883_s18 = int_to_ptr.vmem [resolvable:$true] %s18_s18 }
   0x5   :  { %s731_s21 = scalar_lea.hbm %s1062_s1, 16 }
   0x6   :  { %p732_p0 = scmp.ne.s32.totalorder %s1062_s1, %s731_s21  ;;  %p735_p1 = scmp.lt.u32.totalorder %s731_s21, %s1062_s1 }
   0x8   :  { %p737_p2 = pnand %p735_p1, %p732_p0 }
   0xa   :  { %740 = shalt.err (!%p737_p2)
}
   0xb   :  { %s741_s26 = scalar_lea.vmem %s32_s16, 16  ;;  %s745_s27 = scalar_lea.vmem %s32_s16, 32 }
   0xc   :  { %p742_p3 = scmp.ne.s32.totalorder %s32_s16, %s741_s26  ;;  %p746_p4 = scmp.lt.s32.totalorder %s32_s16, %s32_s16 }
   0xd   :  { %p747_p5 = scmp.lt.s32.totalorder %s745_s27, %s741_s26 }
   0xf   :  { %p748_p6 = por %p747_p5, %p746_p4 }
  0x11   :  { %p749_p7 = pnand %p748_p6, %p742_p3 }
  0x13   :  { %752 = shalt.err (!%p749_p7)
}
  0x14   :  { %34 = dma.hbm_to_vmem [thread:$0]  %s1062_s1, 16, %s32_s16, [#allocation8]  }
  0x15   :  { %s753_s6 = scalar_lea.hbm %s1061_s0, 1024 }
  0x16   :  { %p754_p8 = scmp.ne.s32.totalorder %s1061_s0, %s753_s6  ;;  %p757_p9 = scmp.lt.u32.totalorder %s753_s6, %s1061_s0 }
  0x18   :  { %p759_p10 = pnand %p757_p9, %p754_p8 }
  0x1a   :  { %762 = shalt.err (!%p759_p10)
}
  0x1b   :  { %s763_s11 = scalar_lea.vmem %s883_s18, 1024  ;;  %p768_p12 = scmp.lt.s32.totalorder %s883_s18, %s883_s18 }
  0x1c   :  { %p764_p11 = scmp.ne.s32.totalorder %s883_s18, %s763_s11  ;;  %p769_p13 = scmp.lt.s32.totalorder %s763_s11, %s763_s11 }
  0x1e   :  { %p770_p0 = por %p769_p13, %p768_p12 }
  0x20   :  { %p771_p1 = pnand %p770_p0, %p764_p11 }
  0x22   :  { %774 = shalt.err (!%p771_p1)
}
  0x23   :  { %s851_s1 = smov 128   ;;  %s852_s12 = smov 8  }
  0x24   :  { %24 = dma.hbm_to_vmem [thread:$0]  %s1061_s0, 1024, %s883_s18, [#allocation5], %s851_s1, %s851_s1, %s852_s12  }
  0x25   :  { %s853_s15 = smov [#allocation9]   ;;  %s854_s17 = smov [#allocation10]  }
  0x26   :  { %s40_s16 = sshll.u32 %s853_s15, 4  ;;  %s52_s19 = sshll.u32 %s854_s17, 4  ;;  %s41_s16 = int_to_ptr.vmem [resolvable:$true] %s40_s16  ;;  %s917_s19 = int_to_ptr.vmem [resolvable:$true] %s52_s19 }
  0x27   :  { %s775_s22 = scalar_lea.hbm %s1063_s2, 256 }
  0x28   :  { %p776_p2 = scmp.ne.s32.totalorder %s1063_s2, %s775_s22  ;;  %p779_p3 = scmp.lt.u32.totalorder %s775_s22, %s1063_s2 }
  0x2a   :  { %p781_p4 = pnand %p779_p3, %p776_p2 }
  0x2c   :  { %784 = shalt.err (!%p781_p4)
}
  0x2d   :  { %s785_s0 = scalar_lea.vmem %s41_s16, 256  ;;  %p790_p6 = scmp.lt.s32.totalorder %s41_s16, %s41_s16 }
  0x2e   :  { %p786_p5 = scmp.ne.s32.totalorder %s41_s16, %s785_s0  ;;  %p791_p7 = scmp.lt.s32.totalorder %s785_s0, %s785_s0 }
  0x30   :  { %p792_p8 = por %p791_p7, %p790_p6 }
  0x32   :  { %p793_p9 = pnand %p792_p8, %p786_p5 }
  0x34   :  { %796 = shalt.err (!%p793_p9)
}
  0x35   :  { %46 = dma.hbm_to_vmem [thread:$0]  %s1063_s2, 256, %s41_s16, [#allocation8], %s851_s1, %s851_s1, %s852_s12  }
  0x36   :  { %s797_s30 = scalar_lea.hbm %s1064_s3, 2048 }
  0x37   :  { %p798_p10 = scmp.ne.s32.totalorder %s1064_s3, %s797_s30  ;;  %p801_p11 = scmp.lt.u32.totalorder %s797_s30, %s1064_s3 }
  0x39   :  { %p803_p12 = pnand %p801_p11, %p798_p10 }
  0x3b   :  { %806 = shalt.err (!%p803_p12)
}
  0x3c   :  { %s807_s9 = scalar_lea.vmem %s917_s19, 2048  ;;  %p812_p0 = scmp.lt.s32.totalorder %s917_s19, %s917_s19 }
  0x3d   :  { %p808_p13 = scmp.ne.s32.totalorder %s917_s19, %s807_s9  ;;  %p813_p1 = scmp.lt.s32.totalorder %s807_s9, %s807_s9 }
  0x3f   :  { %p814_p2 = por %p813_p1, %p812_p0 }
  0x41   :  { %p815_p3 = pnand %p814_p2, %p808_p13 }
  0x43   :  { %818 = shalt.err (!%p815_p3)
}
  0x44   :  { %58 = dma.hbm_to_vmem [thread:$0]  %s1064_s3, 2048, %s917_s19, [#allocation11], %s851_s1, %s851_s1, %s852_s12  }
  0x45   :  { %841 = dma.done.wait [#allocation5], 1024  }
  0x46   :  { %842 = vsyncadd [#allocation5], 4294966272 }
  0x47   :  { %843 = dma.done.wait [#allocation8], 272  }
  0x48   :  { %844 = vsyncadd [#allocation8], 4294967024 }
  0x49   :  { %845 = dma.done.wait [#allocation11], 2048  }
  0x4a   :  { %846 = vsyncadd [#allocation11], 4294965248  ;;  %v855_v0 = vmov 0   ;;  %v95_v1 = vld [vmem:[#allocation4 + $0x8] sm:$0xff]  ;;  %v94_v2 = vld [vmem:[#allocation4] sm:$0xff]  ;;  %vm85_vm0 = vcmask 7168  }
  0x4b   :  { %698 = vset.pattern.permute.xlu1 %v855_v0  ;;  %697 = vset.pattern.permute.xlu0 %v855_v0  ;;  %v99_v3 = vld [vmem:[#allocation4 + $0x28] sm:$0xff]  ;;  %v98_v4 = vld [vmem:[#allocation4 + $0x20] sm:$0xff]  ;;  %v316_v5 = vld [vmem:[#allocation10] sm:$0xff]  ;;  %v856_v33 = vmov 0.0   ;;  %s857_s3 = smov [#allocation12]  }
  0x4c   :  { %110 = vperm.xlu1 %698, %v95_v1   ;;  %105 = vperm.xlu0 %697, %v94_v2   ;;  %v317_v6 = vld [vmem:[#allocation10 + $0x8] sm:$0xff]  ;;  %v318_v7 = vld [vmem:[#allocation10 + $0x10] sm:$0xff]  ;;  %v319_v8 = vld [vmem:[#allocation10 + $0x18] sm:$0xff]  ;;  %87 = vst.msk [vmem:[#allocation3 + $0x8] sm:$0xff] %vm85_vm0, %v856_v33  ;;  %s557_s11 = sshll.u32 %s857_s3, 4  ;;  %s558_s11 = int_to_ptr.vmem [resolvable:$true] %s557_s11 }
  0x4d   :  { %v640_v9 = vpack.c.bf16 %v317_v6, %v316_v5  ;;  %v644_v10 = vpack.c.bf16 %v319_v8, %v318_v7  ;;  %v320_v11 = vld [vmem:[#allocation10 + $0x20] sm:$0xff]  ;;  %v321_v12 = vld [vmem:[#allocation10 + $0x28] sm:$0xff]  ;;  %v322_v16 = vld [vmem:[#allocation10 + $0x30] sm:$0xff]  ;;  %86 = vst.msk [vmem:[#allocation3] sm:$0xff] %vm85_vm0, %v856_v33  ;;  %s819_s13 = scalar_lea.vmem %s558_s11, 1024  ;;  %p824_p5 = scmp.lt.s32.totalorder %s558_s11, %s558_s11 }
  0x4e   :  { %v100_v13 = vld [vmem:[#allocation4 + $0x30] sm:$0xff]  ;;  %v648_v15 = vpack.c.bf16 %v321_v12, %v320_v11  ;;  %v101_v18 = vld [vmem:[#allocation4 + $0x38] sm:$0xff]  ;;  %v326_v24 = vld [vmem:[#allocation10 + $0x50] sm:$0xff]  ;;  %88 = vst.msk [vmem:[#allocation3 + $0x10] sm:$0xff] %vm85_vm0, %v856_v33  ;;  %p820_p4 = scmp.ne.s32.totalorder %s558_s11, %s819_s13  ;;  %p825_p6 = scmp.lt.s32.totalorder %s819_s13, %s819_s13 }
  0x4f   :  { %v96_v14 = vld [vmem:[#allocation4 + $0x10] sm:$0xff]  ;;  %641 = vmatprep.subr.bf16.mxu0 %v640_v9  ;;  %672 = vmatprep.subr.bf16.mxu1 %v640_v9  ;;  %v97_v19 = vld [vmem:[#allocation4 + $0x18] sm:$0xff]  ;;  %v330_v30 = vld [vmem:[#allocation10 + $0x70] sm:$0xff]  ;;  %89 = vst.msk [vmem:[#allocation3 + $0x18] sm:$0xff] %vm85_vm0, %v856_v33 }
  0x50   :  { %130 = vperm.xlu1 %698, %v99_v3   ;;  %125 = vperm.xlu0 %697, %v98_v4   ;;  %v323_v17 = vld [vmem:[#allocation10 + $0x38] sm:$0xff]  ;;  %v324_v21 = vld [vmem:[#allocation10 + $0x40] sm:$0xff]  ;;  %v325_v22 = vld [vmem:[#allocation10 + $0x48] sm:$0xff]  ;;  %90 = vst.msk [vmem:[#allocation3 + $0x20] sm:$0xff] %vm85_vm0, %v856_v33  ;;  %p826_p7 = por %p825_p6, %p824_p5 }
  0x51   :  { %643 = vmatpush3.bf16.msra.mxu0 %v640_v9  ;;  %680 = vmatpush3.bf16.msra.mxu1 %v640_v9  ;;  %v652_v20 = vpack.c.bf16 %v323_v17, %v322_v16  ;;  %v656_v23 = vpack.c.bf16 %v325_v22, %v324_v21  ;;  %v327_v25 = vld [vmem:[#allocation10 + $0x58] sm:$0xff]  ;;  %v328_v27 = vld [vmem:[#allocation10 + $0x60] sm:$0xff]  ;;  %v329_v28 = vld [vmem:[#allocation10 + $0x68] sm:$0xff]  ;;  %91 = vst.msk [vmem:[#allocation3 + $0x28] sm:$0xff] %vm85_vm0, %v856_v33 }
  0x52   :  { %645 = vmatprep.subr.bf16.mxu0 %v644_v10  ;;  %673 = vmatprep.subr.bf16.mxu1 %v644_v10  ;;  %v660_v26 = vpack.c.bf16 %v327_v25, %v326_v24  ;;  %v664_v29 = vpack.c.bf16 %v329_v28, %v328_v27  ;;  %v331_v31 = vld [vmem:[#allocation10 + $0x78] sm:$0xff]  ;;  %92 = vst.msk [vmem:[#allocation3 + $0x30] sm:$0xff] %vm85_vm0, %v856_v33  ;;  %93 = vst.msk [vmem:[#allocation3 + $0x38] sm:$0xff] %vm85_vm0, %v856_v33  ;;  %v181_v34 = vld [vmem:[#allocation9] sm:$0xff]  ;;  %p827_p8 = pnand %p826_p7, %p820_p4 }
  0x53   :  { %v668_v32 = vpack.c.bf16 %v331_v31, %v330_v30  ;;  %vm183_vm1 = vnez %v181_v34  ;;  %v182_v35 = vld [vmem:[#allocation9 + $0x8] sm:$0xff]  ;;  %v970_v2 = vld [vmem:[#allocation7] ss:$0 sm:$0xff] }
  0x54   :  { %135 = vperm.xlu1 %698, %v100_v13   ;;  %115 = vperm.xlu0 %697, %v96_v14   ;;  %v185_v36 = vsel %vm183_vm1, 16843009, %v855_v0  ;;  %vm184_vm2 = vnez %v182_v35 }
  0x55   :  { %647 = vmatpush3.bf16.msra.mxu0 %v644_v10  ;;  %681 = vmatpush3.bf16.msra.mxu1 %v644_v10  ;;  %v188_v37 = vunpack.c.1.s8 %v185_v36  ;;  %v186_v38 = vsel %vm184_vm2, 16843009, %v855_v0  ;;  %v187_v39 = vunpack.c.0.s8 %v185_v36  ;;  %v189_v47 = vunpack.c.2.s8 %v185_v36 }
  0x56   :  { %649 = vmatprep.subr.bf16.mxu0 %v648_v15  ;;  %674 = vmatprep.subr.bf16.mxu1 %v648_v15  ;;  %v192_v40 = vunpack.c.1.s8 %v186_v38  ;;  %v191_v41 = vunpack.c.0.s8 %v186_v38  ;;  %v193_v44 = vunpack.c.2.s8 %v186_v38  ;;  %v194_v51 = vunpack.c.3.s8 %v186_v38 }
  0x57   :  { %v197_v42 = vpack.c.b16 %v188_v37, %v188_v37  ;;  %v195_v43 = vpack.c.b16 %v187_v39, %v187_v39  ;;  %v199_v54 = vpack.c.b16 %v189_v47, %v189_v47  ;;  %v190_v57 = vunpack.c.3.s8 %v185_v36 }
  0x58   :  { %140 = vperm.xlu1 %698, %v101_v18   ;;  %120 = vperm.xlu0 %697, %v97_v19   ;;  %v205_v45 = vpack.c.b16 %v192_v40, %v192_v40  ;;  %v203_v46 = vpack.c.b16 %v191_v41, %v191_v41  ;;  %v207_v50 = vpack.c.b16 %v193_v44, %v193_v44  ;;  %v272_v39 = vld [vmem:[#allocation3 + $0x28] sm:$0xff] }
  0x59   :  { %651 = vmatpush3.bf16.msra.mxu0 %v648_v15  ;;  %682 = vmatpush3.bf16.msra.mxu1 %v648_v15  ;;  %v198_v48 = vpack.c.b8 %v197_v42, %v197_v42  ;;  %v196_v49 = vpack.c.b8 %v195_v43, %v195_v43  ;;  %v209_v56 = vpack.c.b16 %v194_v51, %v194_v51 }
  0x5a   :  { %653 = vmatprep.subr.bf16.mxu0 %v652_v20  ;;  %675 = vmatprep.subr.bf16.mxu1 %v652_v20  ;;  %v206_v52 = vpack.c.b8 %v205_v45, %v205_v45  ;;  %v204_v53 = vpack.c.b8 %v203_v46, %v203_v46  ;;  %v208_v55 = vpack.c.b8 %v207_v50, %v207_v50 }
  0x5b   :  { %vm212_vm3 = vnez %v198_v48  ;;  %vm211_vm4 = vnez %v196_v49  ;;  %v200_v59 = vpack.c.b8 %v199_v54, %v199_v54  ;;  %v210_v1 = vpack.c.b8 %v209_v56, %v209_v56 }
  0x5c   :  { %v220_v58 = vsel %vm212_vm3, 16843009, %v855_v0  ;;  %vm216_vm5 = vnez %v206_v52  ;;  %vm215_vm6 = vnez %v204_v53  ;;  %v219_v60 = vsel %vm211_vm4, 16843009, %v855_v0 }
  0x5d   :  { %655 = vmatpush3.bf16.msra.mxu0 %v652_v20  ;;  %683 = vmatpush3.bf16.msra.mxu1 %v652_v20  ;;  %v228_v61 = vunpack.c.0.s8 %v220_v58  ;;  %v224_v62 = vsel %vm216_vm5, 16843009, %v855_v0  ;;  %v223_v63 = vsel %vm215_vm6, 16843009, %v855_v0  ;;  %v227_v3 = vunpack.c.0.s8 %v219_v60 }
  0x5e   :  { %657 = vmatprep.subr.bf16.mxu0 %v656_v23  ;;  %676 = vmatprep.subr.bf16.mxu1 %v656_v23  ;;  %vm217_vm7 = vnez %v208_v55  ;;  %vm213_vm8 = vnez %v200_v59  ;;  %v201_v4 = vpack.c.b16 %v190_v57, %v190_v57  ;;  %v232_v7 = vunpack.c.0.s8 %v224_v62 }
  0x5f   :  { %v231_v8 = vunpack.c.0.s8 %v223_v63  ;;  %v225_v11 = vsel %vm217_vm7, 16843009, %v855_v0  ;;  %v221_v12 = vsel %vm213_vm8, 16843009, %v855_v0  ;;  %vm976_vm9 = vcmp.ne.s32.totalorder %v228_v61, 0 }
  0x60   :  { %vm980_vm10 = vcmp.ne.s32.totalorder %v227_v3, 0  ;;  %vm984_vm11 = vnez %v210_v1  ;;  %v202_v16 = vpack.c.b8 %v201_v4, %v201_v4  ;;  %vm988_vm14 = vcmp.ne.s32.totalorder %v232_v7, 0 }
  0x61   :  { %659 = vmatpush3.bf16.msra.mxu0 %v656_v23  ;;  %684 = vmatpush3.bf16.msra.mxu1 %v656_v23  ;;  %vm992_vm15 = vcmp.ne.s32.totalorder %v231_v8, 0  ;;  %v233_v23 = vunpack.c.0.s8 %v225_v11  ;;  %v229_v24 = vunpack.c.0.s8 %v221_v12  ;;  %v226_v31 = vsel %vm984_vm11, 16843009, %v855_v0 }
  0x62   :  { %661 = vmatprep.subr.bf16.mxu0 %v660_v26  ;;  %677 = vmatprep.subr.bf16.mxu1 %v660_v26  ;;  %vm1005_vm1 = vnez %v202_v16  ;;  %v234_v43 = vunpack.c.0.s8 %v226_v31 }
  0x63   :  { %vm1009_vm4 = vcmp.ne.s32.totalorder %v233_v23, 0  ;;  %vm1013_vm5 = vcmp.ne.s32.totalorder %v229_v24, 0  ;;  %v222_v46 = vsel %vm1005_vm1, 16843009, %v855_v0  ;;  %v271_v23 = vld [vmem:[#allocation3 + $0x20] sm:$0xff] }
  0x64   :  { %v230_v56 = vunpack.c.0.s8 %v222_v46  ;;  %vm1028_vm8 = vcmp.ne.s32.totalorder %v234_v43, 0 }
  0x65   :  { %663 = vmatpush3.bf16.msra.mxu0 %v660_v26  ;;  %685 = vmatpush3.bf16.msra.mxu1 %v660_v26 }
  0x66   :  { %665 = vmatprep.subr.bf16.mxu0 %v664_v29  ;;  %678 = vmatprep.subr.bf16.mxu1 %v664_v29 }
  0x69   :  { %667 = vmatpush3.bf16.msra.mxu0 %v664_v29  ;;  %686 = vmatpush3.bf16.msra.mxu1 %v664_v29 }
  0x6a   :  { %669 = vmatprep.subr.bf16.mxu0 %v668_v32  ;;  %679 = vmatprep.subr.bf16.mxu1 %v668_v32 }
  0x6d   :  { %671 = vmatpush3.bf16.msra.mxu0 %v668_v32  ;;  %687 = vmatpush3.bf16.msra.mxu1 %v668_v32 }
  0xcb   :  { %v111_v5 = vpop.permute.xlu1 %110  ;;  %v106_v6 = vpop.permute.xlu0 %105 }
  0xcc   :  { %v150_v9 = vadd.f32 %v970_v2, %v111_v5  ;;  %v149_v10 = vadd.f32 %v970_v2, %v106_v6 }
  0xce   :  { %vm158_vm12 = vcmp.gt.f32.partialorder %v150_v9, 0.0  ;;  %v166_v17 = vmul.f32 0.2, %v150_v9  ;;  %vm157_vm13 = vcmp.gt.f32.partialorder %v149_v10, 0.0  ;;  %v165_v18 = vmul.f32 0.2, %v149_v10 }
  0xcf   :  { %v131_v20 = vpop.permute.xlu1 %130  ;;  %v126_v22 = vpop.permute.xlu0 %125 }
  0xd0   :  { %v174_v25 = vsel %vm158_vm12, %v150_v9, %v166_v17  ;;  %v173_v26 = vsel %vm157_vm13, %v149_v10, %v165_v18  ;;  %v154_v27 = vadd.f32 %v970_v2, %v131_v20  ;;  %v153_v28 = vadd.f32 %v970_v2, %v126_v22  ;;  %v268_v17 = vld [vmem:[#allocation3 + $0x8] sm:$0xff]  ;;  %v267_v18 = vld [vmem:[#allocation3] sm:$0xff] }
  0xd1   :  { %v244_v29 = vsel %vm976_vm9, %v174_v25, -1e+30  ;;  %v243_v30 = vsel %vm980_vm10, %v173_v26, -1e+30  ;;  %vm238_vm10 = vcmp.ne.s32.totalorder %v230_v56, 0  ;;  %v273_v26 = vld [vmem:[#allocation3 + $0x30] sm:$0xff] }
  0xd2   :  { %v253_v33 = vmul.f32 1.442695, %v244_v29  ;;  %v251_v34 = vmul.f32 1.442695, %v243_v30  ;;  %vm162_vm2 = vcmp.gt.f32.partialorder %v154_v27, 0.0  ;;  %vm161_vm3 = vcmp.gt.f32.partialorder %v153_v28, 0.0 }
  0xd3   :  { %v170_v35 = vmul.f32 0.2, %v154_v27  ;;  %v169_v36 = vmul.f32 0.2, %v153_v28  ;;  %v136_v38 = vpop.permute.xlu1 %135  ;;  %v116_v40 = vpop.permute.xlu0 %115 }
  0xd4   :  { %699 = vpow2.f32 %v253_v33  ;;  %v155_v41 = vadd.f32 %v970_v2, %v136_v38  ;;  %v151_v42 = vadd.f32 %v970_v2, %v116_v40 }
  0xd5   :  { %701 = vpow2.f32 %v251_v34  ;;  %v178_v44 = vsel %vm162_vm2, %v154_v27, %v170_v35  ;;  %v177_v45 = vsel %vm161_vm3, %v153_v28, %v169_v36  ;;  %v269_v27 = vld [vmem:[#allocation3 + $0x10] sm:$0xff]  ;;  %v270_v35 = vld [vmem:[#allocation3 + $0x18] sm:$0xff] }
  0xd6   :  { %v248_v47 = vsel %vm988_vm14, %v178_v44, -1e+30  ;;  %v247_v48 = vsel %vm992_vm15, %v177_v45, -1e+30  ;;  %vm163_vm6 = vcmp.gt.f32.partialorder %v155_v41, 0.0  ;;  %vm159_vm7 = vcmp.gt.f32.partialorder %v151_v42, 0.0 }
  0xd7   :  { %v261_v49 = vmul.f32 1.442695, %v248_v47  ;;  %v259_v50 = vmul.f32 1.442695, %v247_v48  ;;  %v171_v51 = vmul.f32 0.2, %v155_v41  ;;  %v141_v52 = vpop.permute.xlu1 %140  ;;  %v121_v53 = vpop.permute.xlu0 %120 }
  0xd8   :  { %v167_v54 = vmul.f32 0.2, %v151_v42  ;;  %v156_v55 = vadd.f32 %v970_v2, %v141_v52  ;;  %v152_v57 = vadd.f32 %v970_v2, %v121_v53  ;;  %v274_v44 = vld [vmem:[#allocation3 + $0x38] sm:$0xff] }
  0xd9   :  { %703 = vpow2.f32 %v261_v49  ;;  %v179_v0 = vsel %vm163_vm6, %v155_v41, %v171_v51 }
  0xda   :  { %705 = vpow2.f32 %v259_v50  ;;  %v249_v59 = vsel %vm1009_vm4, %v179_v0, -1e+30  ;;  %v175_v60 = vsel %vm159_vm7, %v151_v42, %v167_v54  ;;  %vm164_vm9 = vcmp.gt.f32.partialorder %v156_v55, 0.0 }
  0xdb   :  { %v263_v61 = vmul.f32 1.442695, %v249_v59  ;;  %v245_v62 = vsel %vm1013_vm5, %v175_v60, -1e+30  ;;  %v172_v63 = vmul.f32 0.2, %v156_v55 }
  0xdc   :  { %v255_v1 = vmul.f32 1.442695, %v245_v62  ;;  %vm160_vm11 = vcmp.gt.f32.partialorder %v152_v57, 0.0  ;;  %v168_v2 = vmul.f32 0.2, %v152_v57 }
  0xdd   :  { %707 = vpow2.f32 %v263_v61  ;;  %v180_v3 = vsel %vm164_vm9, %v156_v55, %v172_v63 }
  0xde   :  { %v700_v4 = vpop.eup %699  ;;  %709 = vpow2.f32 %v255_v1  ;;  %v250_v5 = vsel %vm1028_vm8, %v180_v3, -1e+30  ;;  %v176_v6 = vsel %vm160_vm11, %v152_v57, %v168_v2 }
  0xdf   :  { %v702_v7 = vpop.eup %701  ;;  %v265_v8 = vmul.f32 1.442695, %v250_v5  ;;  %v246_v9 = vsel %vm238_vm10, %v176_v6, -1e+30  ;;  %277 = vadd.xlane.f32.xlu1 %v700_v4 }
  0xe0   :  { %v257_v10 = vmul.f32 1.442695, %v246_v9  ;;  %275 = vadd.xlane.f32.xlu0 %v702_v7  ;;  %628 = vmatprep.mubr.f32.mxu0 %v702_v7 }
  0xe1   :  { %711 = vpow2.f32 %v265_v8  ;;  %629 = vmatmul.mubr.f32.vlgmr.msra.gmra.mrb[0].mxu0 %v700_v4 }
  0xe2   :  { %713 = vpow2.f32 %v257_v10 }
  0xe3   :  { %v704_v11 = vpop.eup %703 }
  0xe4   :  { %v706_v12 = vpop.eup %705 }
  0xe5   :  { %283 = vadd.xlane.f32.xlu1 %v706_v12  ;;  %634 = vmatprep.mubr.f32.mxu1 %v706_v12 }
  0xe6   :  { %635 = vmatmul.mubr.f32.vlgmr.msra.gmra.mrb[0].mxu1 %v704_v11 }
  0xe7   :  { %v708_v13 = vpop.eup %707 }
  0xe8   :  { %v710_v14 = vpop.eup %709  ;;  %637 = vmatprep.mubr.f32.mxu1 %v708_v13 }
  0xe9   :  { %287 = vadd.xlane.f32.xlu1 %v708_v13  ;;  %279 = vadd.xlane.f32.xlu0 %v710_v14 }
  0xea   :  { %631 = vmatprep.mubr.f32.mxu0 %v710_v14 }
  0xeb   :  { %v712_v15 = vpop.eup %711 }
  0xec   :  { %v714_v16 = vpop.eup %713  ;;  %638 = vmatmul.mubr.f32.gmra.mrb[2].mxu1 %v712_v15 }
  0xed   :  { %281 = vadd.xlane.f32.xlu0 %v714_v16  ;;  %632 = vmatmul.mubr.f32.gmra.mrb[2].mxu0 %v714_v16 }
  0xf1   :  { %285 = vadd.xlane.f32.xlu0 %v704_v11 }
  0xf5   :  { %289 = vadd.xlane.f32.xlu0 %v712_v15 }
 0x16c   :  { %v278_v19 = vpop.xlane.xlu1 %277 }
 0x16d   :  { %v292_v20 = vadd.f32 %v278_v19, %v268_v17  ;;  %v276_v21 = vpop.xlane.xlu0 %275 }
 0x16e   :  { %v291_v22 = vadd.f32 %v276_v21, %v267_v18 }
 0x16f   :  { %301 = vst.msk [vmem:[#allocation3 + $0x8] sm:$0xff] %vm85_vm0, %v292_v20 }
 0x170   :  { %300 = vst.msk [vmem:[#allocation3] sm:$0xff] %vm85_vm0, %v291_v22 }
 0x172   :  { %v284_v24 = vpop.xlane.xlu1 %283 }
 0x173   :  { %v295_v25 = vadd.f32 %v284_v24, %v271_v23 }
 0x175   :  { %304 = vst.msk [vmem:[#allocation3 + $0x20] sm:$0xff] %vm85_vm0, %v295_v25 }
 0x176   :  { %v288_v28 = vpop.xlane.xlu1 %287  ;;  %v280_v29 = vpop.xlane.xlu0 %279  ;;  %v457_v30 = vld [vmem:[#allocation3 + $0x8] sm:$0xff] }
 0x177   :  { %v297_v31 = vadd.f32 %v288_v28, %v273_v26  ;;  %v293_v32 = vadd.f32 %v280_v29, %v269_v27  ;;  %v465_v33 = vmax.f32 %v457_v30, 1e-30  ;;  %v456_v34 = vld [vmem:[#allocation3] sm:$0xff] }
 0x178   :  { %v464_v36 = vmax.f32 %v456_v34, 1e-30 }
 0x179   :  { %306 = vst.msk [vmem:[#allocation3 + $0x30] sm:$0xff] %vm85_vm0, %v297_v31  ;;  %302 = vst.msk [vmem:[#allocation3 + $0x10] sm:$0xff] %vm85_vm0, %v293_v32  ;;  %715 = vrcp.f32 %v465_v33 }
 0x17a   :  { %v282_v37 = vpop.xlane.xlu0 %281  ;;  %717 = vrcp.f32 %v464_v36 }
 0x17b   :  { %v294_v38 = vadd.f32 %v282_v37, %v270_v35 }
 0x17c   :  { %v460_v40 = vld [vmem:[#allocation3 + $0x20] sm:$0xff] }
 0x17d   :  { %303 = vst.msk [vmem:[#allocation3 + $0x18] sm:$0xff] %vm85_vm0, %v294_v38  ;;  %v468_v41 = vmax.f32 %v460_v40, 1e-30 }
 0x17e   :  { %v286_v42 = vpop.xlane.xlu0 %285 }
 0x17f   :  { %v296_v43 = vadd.f32 %v286_v42, %v272_v39  ;;  %719 = vrcp.f32 %v468_v41 }
 0x180   :  { %v462_v45 = vld [vmem:[#allocation3 + $0x30] sm:$0xff] }
 0x181   :  { %v458_v46 = vld [vmem:[#allocation3 + $0x10] sm:$0xff]  ;;  %305 = vst.msk [vmem:[#allocation3 + $0x28] sm:$0xff] %vm85_vm0, %v296_v43  ;;  %v470_v47 = vmax.f32 %v462_v45, 1e-30 }
 0x182   :  { %v466_v48 = vmax.f32 %v458_v46, 1e-30  ;;  %v290_v49 = vpop.xlane.xlu0 %289 }
 0x183   :  { %v716_v50 = vpop.eup %715  ;;  %v298_v51 = vadd.f32 %v290_v49, %v274_v44  ;;  %721 = vrcp.f32 %v470_v47 }
 0x184   :  { %v718_v52 = vpop.eup %717  ;;  %503 = vperm.xlu0 %697, %v716_v50   ;;  %723 = vrcp.f32 %v466_v48  ;;  %v459_v53 = vld [vmem:[#allocation3 + $0x18] sm:$0xff] }
 0x185   :  { %307 = vst.msk [vmem:[#allocation3 + $0x38] sm:$0xff] %vm85_vm0, %v298_v51  ;;  %498 = vperm.xlu1 %698, %v718_v52   ;;  %v467_v54 = vmax.f32 %v459_v53, 1e-30 }
 0x187   :  { %725 = vrcp.f32 %v467_v54 }
 0x188   :  { %v461_v55 = vld [vmem:[#allocation3 + $0x28] sm:$0xff] }
 0x189   :  { %v720_v56 = vpop.eup %719  ;;  %v469_v57 = vmax.f32 %v461_v55, 1e-30 }
 0x18a   :  { %518 = vperm.xlu0 %697, %v720_v56  }
 0x18b   :  { %727 = vrcp.f32 %v469_v57 }
 0x18c   :  { %v463_v0 = vld [vmem:[#allocation3 + $0x38] sm:$0xff] }
 0x18d   :  { %v722_v58 = vpop.eup %721  ;;  %v471_v59 = vmax.f32 %v463_v0, 1e-30 }
 0x18e   :  { %v724_v60 = vpop.eup %723  ;;  %528 = vperm.xlu0 %697, %v722_v58  }
 0x18f   :  { %508 = vperm.xlu1 %698, %v724_v60   ;;  %729 = vrcp.f32 %v471_v59 }
 0x191   :  { %v726_v61 = vpop.eup %725 }
 0x193   :  { %513 = vperm.xlu1 %698, %v726_v61  }
 0x195   :  { %v728_v62 = vpop.eup %727 }
 0x197   :  { %523 = vperm.xlu1 %698, %v728_v62  }
 0x199   :  { %v730_v63 = vpop.eup %729 }
 0x19b   :  { %533 = vperm.xlu1 %698, %v730_v63  }
 0x1b4   :  { %v630_v1 = vpop.f32.mrb[0].mxu0 }
 0x1b5   :  { %v398_v2 = vpop.f32.mrb[1].mxu0 }
 0x1b9   :  { %v636_v3 = vpop.f32.mrb[0].mxu1 }
 0x1ba   :  { %v418_v4 = vpop.f32.mrb[1].mxu1 }
 0x1bf   :  { %v639_v5 = vpop.f32.mrb[2].mxu1 }
 0x1c0   :  { %v633_v6 = vpop.f32.mrb[2].mxu0  ;;  %v428_v7 = vpop.f32.mrb[3].mxu1 }
 0x1c1   :  { %v408_v8 = vpop.f32.mrb[3].mxu0 }
 0x203   :  { %v504_v9 = vpop.permute.xlu0 %503 }
 0x204   :  { %v537_v10 = vmul.f32 %v630_v1, %v504_v9  ;;  %v499_v11 = vpop.permute.xlu1 %498 }
 0x205   :  { %v536_v12 = vmul.f32 %v499_v11, %v398_v2 }
 0x206   :  { %545 = vst [vmem:[#allocation12 + $0x8] sm:$0xff] %v537_v10 }
 0x207   :  { %544 = vst [vmem:[#allocation12] sm:$0xff] %v536_v12 }
 0x209   :  { %v519_v13 = vpop.permute.xlu0 %518 }
 0x20a   :  { %v540_v14 = vmul.f32 %v519_v13, %v418_v4 }
 0x20c   :  { %548 = vst [vmem:[#allocation12 + $0x20] sm:$0xff] %v540_v14 }
 0x20d   :  { %v529_v15 = vpop.permute.xlu0 %528 }
 0x20e   :  { %v542_v16 = vmul.f32 %v529_v15, %v428_v7  ;;  %v509_v17 = vpop.permute.xlu1 %508 }
 0x20f   :  { %v538_v18 = vmul.f32 %v509_v17, %v408_v8 }
 0x210   :  { %550 = vst [vmem:[#allocation12 + $0x30] sm:$0xff] %v542_v16 }
 0x211   :  { %546 = vst [vmem:[#allocation12 + $0x10] sm:$0xff] %v538_v18 }
 0x212   :  { %v514_v19 = vpop.permute.xlu1 %513 }
 0x213   :  { %v539_v20 = vmul.f32 %v633_v6, %v514_v19 }
 0x215   :  { %547 = vst [vmem:[#allocation12 + $0x18] sm:$0xff] %v539_v20 }
 0x216   :  { %v524_v21 = vpop.permute.xlu1 %523 }
 0x217   :  { %v541_v22 = vmul.f32 %v636_v3, %v524_v21 }
 0x219   :  { %549 = vst [vmem:[#allocation12 + $0x28] sm:$0xff] %v541_v22 }
 0x21a   :  { %v534_v23 = vpop.permute.xlu1 %533 }
 0x21b   :  { %v543_v24 = vmul.f32 %v639_v5, %v534_v23 }
 0x21d   :  { %551 = vst [vmem:[#allocation12 + $0x38] sm:$0xff] %v543_v24 }
 0x21e   :  { %830 = shalt.err (!%p827_p8)
}
 0x21f   :  { %s831_s16 = scalar_lea.hbm %s1065_s4, 1024 }
 0x220   :  { %p832_p9 = scmp.ne.s32.totalorder %s1065_s4, %s831_s16  ;;  %p835_p10 = scmp.lt.u32.totalorder %s831_s16, %s1065_s4 }
 0x222   :  { %p837_p11 = pnand %p835_p10, %p832_p9 }
 0x224   :  { %840 = shalt.err (!%p837_p11)
}
 0x225   :  { %563 = dma.vmem_to_hbm [thread:$0]  %s558_s11, 1024, %s1065_s4, [#allocation6], %s851_s1, %s851_s1, %s852_s12  }
 0x226   :  { %847 = dma.done.wait [#allocation6], 1024  }
 0x227   :  { %848 = vsyncadd [#allocation6], 4294966272 }
 0x228   :  { %567 = vsyncpa [#allocation5], 1 }
 0x229   :  { %568 = vsyncpa [#allocation8], 1 }
 0x22a   :  { %569 = vsyncpa [#allocation11], 1 }
 0x22b   :  { %570 = vsyncpa [#allocation6], 1 }

</bundles_post_ra>
